<compile_context>
chip_gen: v5e
topology: v5e:2x2
jax: 0.10.0
libtpu: 0.0.40
codegen_flags: <defaults>
</compile_context>

<pallas_src>
import functools

import jax
import jax.numpy as jnp
from jax.experimental import pallas as pl
from jax.experimental.pallas import tpu as pltpu


def _qwk_partials_kernel(logits_ref, targets_ref, part_ref,
                         num_acc, sq_acc, pd_acc, n_acc,
                         *, batch, block_b, nb_per_group, half_rows):
    g = pl.program_id(0)   # group axis ("parallel": split across v7x cores)
    i = pl.program_id(1)   # batch-block axis ("arbitrary": carried accumulators)

    @pl.when(i == 0)
    def _init():
        num_acc[...] = jnp.zeros_like(num_acc)
        sq_acc[...] = jnp.zeros_like(sq_acc)
        pd_acc[...] = jnp.zeros_like(pd_acc)
        n_acc[...] = jnp.zeros_like(n_acc)

    C, TB = logits_ref.shape
    logits = logits_ref[...].astype(jnp.float32)        # (C, TB) single up-front cast
    t = targets_ref[...]                                # (1, TB) int32

    # Which lanes (batch columns) of this block are real.  Uses the *logical*
    # block position, so both the ragged tail and fully-OOB (index-clamped)
    # blocks contribute exactly zero.
    col0 = (g * nb_per_group + i) * block_b
    col_ids = col0 + jax.lax.broadcasted_iota(jnp.int32, (1, TB), 1)
    col_valid = col_ids < batch                          # (1, TB) bool
    col_valid_f = col_valid.astype(jnp.float32)

    # Mask garbage lanes before exp (handles undefined tail data, even NaN/inf).
    logits = jnp.where(col_valid, logits, 0.0)

    # Numerically stable softmax across the C sublanes; one divide per column,
    # then cheap VPU multiplies (exact divide kept for torch f32 parity).
    m = jnp.max(logits, axis=0, keepdims=True)           # (1, TB)
    e = jnp.exp(logits - m)                              # (C, TB)
    s = jnp.sum(e, axis=0, keepdims=True)                # (1, TB)
    inv = col_valid_f / s                                # 0 on invalid lanes
    p = e * inv                                          # probs, 0 on invalid lanes

    # Quadratic-kappa weights on the fly: w[j, b] = (t_b - j)^2, zeroed for
    # out-of-range targets (one_hot semantics) and invalid lanes.
    t_in_range = jnp.logical_and(t >= 0, t < C)
    t_valid = jnp.logical_and(t_in_range, col_valid)     # (1, TB)
    t_valid_f = t_valid.astype(jnp.float32)
    t_safe = jnp.where(t_valid, t, 0)
    class_ids = jax.lax.broadcasted_iota(jnp.int32, (C, TB), 0)
    d = (class_ids - t_safe).astype(jnp.float32)
    w = d * d * t_valid_f                                # (C, TB)

    # Per-lane accumulation (pure VPU adds); no cross-lane reductions in the
    # steady state.
    num_acc[...] += w * p
    sq_acc[...] += w
    pd_acc[...] += p
    n_acc[...] += t_valid_f

    # Single cross-lane reduction per group, only at the very end.
    @pl.when(i == pl.num_programs(1) - 1)
    def _finalize():
        sq = jnp.sum(sq_acc[...], axis=1, keepdims=True)   # (C, 1)
        pd = jnp.sum(pd_acc[...], axis=1, keepdims=True)   # (C, 1)
        num = jnp.sum(num_acc[...], keepdims=True)         # (1, 1)
        n = jnp.sum(n_acc[...], keepdims=True)             # (1, 1)
        lanes = part_ref.shape[-1]
        # Pack per-group partials into lane-broadcast rows; the wrapper reads
        # lane 0 of each used row.
        part_ref[0, 0:C, :] = jnp.broadcast_to(sq, (C, lanes))
        part_ref[0, C:C + 1, :] = jnp.broadcast_to(num, (1, lanes))
        part_ref[0, C + 1:C + 2, :] = jnp.broadcast_to(n, (1, lanes))
        part_ref[0, half_rows:half_rows + C, :] = jnp.broadcast_to(pd, (C, lanes))


def qwk_loss(logits, targets, num_classes=5, eps=1e-10, scaling_factor=1.0,
             block_b=65536, num_groups=2):
    """Pallas implementation of QWKLoss.forward(logits, targets)."""
    B, C = logits.shape
    assert C == num_classes

    # Lane-dense layout: classes on sublanes, batch on lanes.  bf16 logits are
    # passed straight through (the kernel does the single f32 cast).
    logits_t = jnp.transpose(logits)                      # (C, B)
    targets_row = targets.astype(jnp.int32).reshape(1, B)

    # Batch tile: lane axis must be a multiple of 128 unless it spans the
    # whole batch (no padding is ever materialized; tails are masked).
    if B <= block_b:
        tb = B
    else:
        tb = max(128, (block_b // 128) * 128)
        if tb > B:
            tb = B

    nb_total = pl.cdiv(B, tb)                 # total batch blocks (ragged tail ok)
    ng = num_groups if nb_total >= num_groups else 1
    nb = pl.cdiv(nb_total, ng)                # blocks per group
    last_blk = nb_total - 1

    half = ((C + 2 + 7) // 8) * 8             # sublane-aligned half of partials block
    R = 2 * half

    def data_map(g, i):
        # Clamp fully out-of-range blocks (odd block counts) onto a valid block;
        # the kernel's col_valid masking (computed from the unclamped logical
        # position) zeroes their contribution.
        return (0, jnp.minimum(g * nb + i, last_blk))

    kernel = functools.partial(_qwk_partials_kernel, batch=B, block_b=tb,
                               nb_per_group=nb, half_rows=half)

    parts = pl.pallas_call(
        kernel,
        out_shape=jax.ShapeDtypeStruct((ng, R, 128), jnp.float32),
        grid=(ng, nb),
        in_specs=[
            pl.BlockSpec((C, tb), data_map),     # logits (classes x batch-lane)
            pl.BlockSpec((1, tb), data_map),     # targets (1 x batch-lane)
        ],
        out_specs=pl.BlockSpec((1, R, 128), lambda g, i: (g, 0, 0)),
        scratch_shapes=[
            pltpu.VMEM((C, tb), jnp.float32),    # per-lane sum of w * p
            pltpu.VMEM((C, tb), jnp.float32),    # per-lane sum of w
            pltpu.VMEM((C, tb), jnp.float32),    # per-lane sum of p
            pltpu.VMEM((1, tb), jnp.float32),    # per-lane count of valid targets
        ],
        compiler_params=pltpu.CompilerParams(
            dimension_semantics=("parallel", "arbitrary"),
            # Explicit: v5e's default scoped VMEM is only 16 MiB; the default
            # 64K-lane tile needs ~17 MiB of tiles + accumulators.
            vmem_limit_bytes=32 * 1024 * 1024,
        ),
    )(logits_t, targets_row)

    # Tiny cross-group combine (12 values per group) + final scalar math.
    sq = jnp.sum(parts[:, 0:C, 0], axis=0)                # (C,)
    pd = jnp.sum(parts[:, half:half + C, 0], axis=0)      # (C,)
    num_raw = jnp.sum(parts[:, C, 0])
    n = jnp.sum(parts[:, C + 1, 0])
    den_raw = jnp.sum(sq * pd)

    n_safe = jnp.where(n == 0.0, 1.0, n)
    # kappa = 1 - num/(den+eps);  loss = (1 - kappa)*scaling = scaling*num/(den+eps)
    loss = scaling_factor * (num_raw / n_safe) / (den_raw / n_safe + eps)
    return jnp.where(n == 0.0, jnp.float32(0.0), loss)    # torch returns 0 when N == 0


def qwk_loss_ref(logits, targets, num_classes=5, eps=1e-10, scaling_factor=1.0):
    """Pure-JAX reference mirroring the PyTorch module (f32-exact contraction)."""
    probs = jax.nn.softmax(logits.astype(jnp.float32), axis=1)
    one_hot = jax.nn.one_hot(targets, num_classes, dtype=jnp.float32)
    idx = jnp.arange(num_classes, dtype=jnp.float32)
    w = (idx[:, None] - idx[None, :]) ** 2
    O = jnp.einsum("bi,bj->ij", one_hot, probs,
                   precision=jax.lax.Precision.HIGHEST)
    E = one_hot.sum(0)[:, None] * probs.sum(0)[None, :]
    N = jnp.sum(O)
    O = O / N
    E = E / N
    num = jnp.sum(w * O)
    den = jnp.sum(w * E)
    kappa = 1.0 - num / (den + eps)
    return (1.0 - kappa) * scaling_factor


if __name__ == "__main__":
    key = jax.random.PRNGKey(0)
    keys = jax.random.split(key, 8)
    C = 5

    # 1) The actual training configuration: per-device batch 64, 5 classes.
    B = 64
    logits = jax.random.normal(keys[0], (B, C), dtype=jnp.float32)
    targets = jax.random.randint(keys[1], (B,), 0, C, dtype=jnp.int32)
    loss = qwk_loss(logits, targets, num_classes=C)
    jax.block_until_ready(loss)
    ref = qwk_loss_ref(logits, targets, num_classes=C)
    assert jnp.allclose(loss, ref, rtol=1e-5, atol=1e-6), (loss, ref)

    # 2) Gridded case: 2 groups x 2 blocks with a masked ragged tail (no pad).
    B2 = 1000
    logits2 = jax.random.normal(keys[2], (B2, C), dtype=jnp.float32) * 3.0
    targets2 = jax.random.randint(keys[3], (B2,), 0, C, dtype=jnp.int32)
    loss2 = qwk_loss(logits2, targets2, num_classes=C, block_b=256)
    jax.block_until_ready(loss2)
    ref2 = qwk_loss_ref(logits2, targets2, num_classes=C)
    assert jnp.allclose(loss2, ref2, rtol=1e-5, atol=1e-6), (loss2, ref2)

    # 3) Odd block count: group 1 gets one real (ragged) block plus one fully
    #    out-of-range block that is index-clamped and masked to zero.
    B3 = 700
    logits3 = jax.random.normal(keys[4], (B3, C), dtype=jnp.float32)
    targets3 = jax.random.randint(keys[5], (B3,), 0, C, dtype=jnp.int32)
    loss3 = qwk_loss(logits3, targets3, num_classes=C, block_b=256)
    jax.block_until_ready(loss3)
    ref3 = qwk_loss_ref(logits3, targets3, num_classes=C)
    assert jnp.allclose(loss3, ref3, rtol=1e-5, atol=1e-6), (loss3, ref3)

    # 4) bf16 logits passed straight through (single in-kernel f32 cast).
    B4 = 333
    logits4 = jax.random.normal(keys[6], (B4, C), dtype=jnp.bfloat16)
    targets4 = jax.random.randint(keys[7], (B4,), 0, C, dtype=jnp.int32)
    loss4 = qwk_loss(logits4, targets4, num_classes=C, block_b=128)
    jax.block_until_ready(loss4)
    ref4 = qwk_loss_ref(logits4, targets4, num_classes=C)
    assert jnp.allclose(loss4, ref4, rtol=1e-4, atol=1e-5), (loss4, ref4)

    print("KERNEL_OK")
</pallas_src>

<mosaic_0001>
module attributes {stable_mosaic.version = 11 : i64} {
  func.func @_qwk_partials_kernel(%arg0: i32, %arg1: i32, %arg2: memref<5x64xf32, #tpu.memory_space<vmem>>, %arg3: memref<1x64xi32, #tpu.memory_space<vmem>>, %arg4: memref<1x16x128xf32, #tpu.memory_space<vmem>>, %arg5: memref<5x64xf32, #tpu.memory_space<vmem>>, %arg6: memref<5x64xf32, #tpu.memory_space<vmem>>, %arg7: memref<5x64xf32, #tpu.memory_space<vmem>>, %arg8: memref<1x64xf32, #tpu.memory_space<vmem>>) attributes {dimension_semantics = [#tpu.dimension_semantics<parallel>, #tpu.dimension_semantics<arbitrary>], iteration_bounds = array<i64: 1, 1>, scalar_prefetch = 0 : i64, scratch_operands = 4 : i64, tpu.core_type = #tpu.core_type<tc>, window_params = [{transform_indices = @transform_0, window_bounds = array<i64: 5, 64>}, {transform_indices = @transform_1, window_bounds = array<i64: 1, 64>}, {transform_indices = @transform_2, window_bounds = array<i64: 1, 16, 128>}]} {
    %c0_i32 = arith.constant 0 : i32
    %0 = arith.cmpi eq, %arg1, %c0_i32 : i32
    %1 = arith.extui %0 : i1 to i32
    %c0_i32_0 = arith.constant 0 : i32
    %2 = arith.cmpi ne, %1, %c0_i32_0 : i32
    scf.if %2 {
      %cst_27 = arith.constant 0.000000e+00 : f32
      %62 = vector.broadcast %cst_27 : f32 to vector<5x64xf32>
      %c0_28 = arith.constant 0 : index
      %c0_29 = arith.constant 0 : index
      %63 = vector.load %arg5[%c0_28, %c0_29] : memref<5x64xf32, #tpu.memory_space<vmem>>, vector<5x64xf32>
      tpu.vector_store %arg5[%c0_28, %c0_29], %62 {strides = array<i32>} : memref<5x64xf32, #tpu.memory_space<vmem>>, vector<5x64xf32>,
      %cst_30 = arith.constant 0.000000e+00 : f32
      %64 = vector.broadcast %cst_30 : f32 to vector<5x64xf32>
      %c0_31 = arith.constant 0 : index
      %c0_32 = arith.constant 0 : index
      %65 = vector.load %arg6[%c0_31, %c0_32] : memref<5x64xf32, #tpu.memory_space<vmem>>, vector<5x64xf32>
      tpu.vector_store %arg6[%c0_31, %c0_32], %64 {strides = array<i32>} : memref<5x64xf32, #tpu.memory_space<vmem>>, vector<5x64xf32>,
      %cst_33 = arith.constant 0.000000e+00 : f32
      %66 = vector.broadcast %cst_33 : f32 to vector<5x64xf32>
      %c0_34 = arith.constant 0 : index
      %c0_35 = arith.constant 0 : index
      %67 = vector.load %arg7[%c0_34, %c0_35] : memref<5x64xf32, #tpu.memory_space<vmem>>, vector<5x64xf32>
      tpu.vector_store %arg7[%c0_34, %c0_35], %66 {strides = array<i32>} : memref<5x64xf32, #tpu.memory_space<vmem>>, vector<5x64xf32>,
      %cst_36 = arith.constant 0.000000e+00 : f32
      %68 = vector.broadcast %cst_36 : f32 to vector<1x64xf32>
      %c0_37 = arith.constant 0 : index
      %c0_38 = arith.constant 0 : index
      %69 = vector.load %arg8[%c0_37, %c0_38] : memref<1x64xf32, #tpu.memory_space<vmem>>, vector<1x64xf32>
      tpu.vector_store %arg8[%c0_37, %c0_38], %68 {strides = array<i32>} : memref<1x64xf32, #tpu.memory_space<vmem>>, vector<1x64xf32>,
    } else {
    }
    %c0 = arith.constant 0 : index
    %c0_1 = arith.constant 0 : index
    %3 = vector.load %arg2[%c0, %c0_1] : memref<5x64xf32, #tpu.memory_space<vmem>>, vector<5x64xf32>
    %c0_2 = arith.constant 0 : index
    %c0_3 = arith.constant 0 : index
    %4 = vector.load %arg3[%c0_2, %c0_3] : memref<1x64xi32, #tpu.memory_space<vmem>>, vector<1x64xi32>
    %c1_i32 = arith.constant 1 : i32
    %5 = arith.muli %arg0, %c1_i32 : i32
    %6 = arith.addi %5, %arg1 : i32
    %c64_i32 = arith.constant 64 : i32
    %7 = arith.muli %6, %c64_i32 : i32
    %8 = tpu.iota {dimensions = array<i32: 1>} : vector<1x64xi32>
    %9 = vector.broadcast %7 : i32 to vector<1x64xi32>
    %10 = arith.addi %9, %8 : vector<1x64xi32>
    %c64_i32_4 = arith.constant 64 : i32
    %11 = vector.broadcast %c64_i32_4 : i32 to vector<1x64xi32>
    %12 = arith.cmpi slt, %10, %11 : vector<1x64xi32>
    %13 = arith.extui %12 : vector<1x64xi1> to vector<1x64xi32>
    %14 = arith.sitofp %13 : vector<1x64xi32> to vector<1x64xf32>
    %cst = arith.constant 0.000000e+00 : f32
    %15 = vector.shape_cast %12 : vector<1x64xi1> to vector<1x64xi1>
    %16 = vector.broadcast %15 : vector<1x64xi1> to vector<5x64xi1>
    %17 = vector.broadcast %cst : f32 to vector<5x64xf32>
    %18 = arith.select %16, %3, %17 : vector<5x64xi1>, vector<5x64xf32>
    %cst_5 = arith.constant dense<0xFF800000> : vector<64xf32>
    %19 = vector.multi_reduction <maximumf>, %18, %cst_5 [0] : vector<5x64xf32> to vector<64xf32>
    %20 = vector.shape_cast %19 : vector<64xf32> to vector<1x64xf32>
    %21 = vector.broadcast %20 : vector<1x64xf32> to vector<5x64xf32>
    %22 = arith.subf %18, %21 : vector<5x64xf32>
    %23 = math.exp %22 : vector<5x64xf32>
    %cst_6 = arith.constant dense<0.000000e+00> : vector<64xf32>
    %24 = vector.multi_reduction <add>, %23, %cst_6 [0] : vector<5x64xf32> to vector<64xf32>
    %25 = vector.shape_cast %24 : vector<64xf32> to vector<1x64xf32>
    %26 = arith.divf %14, %25 : vector<1x64xf32>
    %27 = vector.broadcast %26 : vector<1x64xf32> to vector<5x64xf32>
    %28 = arith.mulf %23, %27 : vector<5x64xf32>
    %c0_i32_7 = arith.constant 0 : i32
    %29 = vector.broadcast %c0_i32_7 : i32 to vector<1x64xi32>
    %30 = arith.cmpi sge, %4, %29 : vector<1x64xi32>
    %c5_i32 = arith.constant 5 : i32
    %31 = vector.broadcast %c5_i32 : i32 to vector<1x64xi32>
    %32 = arith.cmpi slt, %4, %31 : vector<1x64xi32>
    %33 = arith.andi %30, %32 : vector<1x64xi1>
    %34 = arith.andi %33, %12 : vector<1x64xi1>
    %35 = arith.extui %34 : vector<1x64xi1> to vector<1x64xi32>
    %36 = arith.sitofp %35 : vector<1x64xi32> to vector<1x64xf32>
    %c0_i32_8 = arith.constant 0 : i32
    %37 = vector.broadcast %c0_i32_8 : i32 to vector<1x64xi32>
    %38 = arith.select %34, %4, %37 : vector<1x64xi1>, vector<1x64xi32>
    %39 = tpu.iota {dimensions = array<i32: 0>} : vector<5x64xi32>
    %40 = vector.broadcast %38 : vector<1x64xi32> to vector<5x64xi32>
    %41 = arith.subi %39, %40 : vector<5x64xi32>
    %42 = arith.sitofp %41 : vector<5x64xi32> to vector<5x64xf32>
    %43 = arith.mulf %42, %42 : vector<5x64xf32>
    %44 = vector.broadcast %36 : vector<1x64xf32> to vector<5x64xf32>
    %45 = arith.mulf %43, %44 : vector<5x64xf32>
    %c0_9 = arith.constant 0 : index
    %c0_10 = arith.constant 0 : index
    %46 = vector.load %arg5[%c0_9, %c0_10] : memref<5x64xf32, #tpu.memory_space<vmem>>, vector<5x64xf32>
    %47 = arith.mulf %45, %28 : vector<5x64xf32>
    %48 = arith.addf %46, %47 : vector<5x64xf32>
    %c0_11 = arith.constant 0 : index
    %c0_12 = arith.constant 0 : index
    %49 = vector.load %arg5[%c0_11, %c0_12] : memref<5x64xf32, #tpu.memory_space<vmem>>, vector<5x64xf32>
    tpu.vector_store %arg5[%c0_11, %c0_12], %48 {strides = array<i32>} : memref<5x64xf32, #tpu.memory_space<vmem>>, vector<5x64xf32>,
    %c0_13 = arith.constant 0 : index
    %c0_14 = arith.constant 0 : index
    %50 = vector.load %arg6[%c0_13, %c0_14] : memref<5x64xf32, #tpu.memory_space<vmem>>, vector<5x64xf32>
    %51 = arith.addf %50, %45 : vector<5x64xf32>
    %c0_15 = arith.constant 0 : index
    %c0_16 = arith.constant 0 : index
    %52 = vector.load %arg6[%c0_15, %c0_16] : memref<5x64xf32, #tpu.memory_space<vmem>>, vector<5x64xf32>
    tpu.vector_store %arg6[%c0_15, %c0_16], %51 {strides = array<i32>} : memref<5x64xf32, #tpu.memory_space<vmem>>, vector<5x64xf32>,
    %c0_17 = arith.constant 0 : index
    %c0_18 = arith.constant 0 : index
    %53 = vector.load %arg7[%c0_17, %c0_18] : memref<5x64xf32, #tpu.memory_space<vmem>>, vector<5x64xf32>
    %54 = arith.addf %53, %28 : vector<5x64xf32>
    %c0_19 = arith.constant 0 : index
    %c0_20 = arith.constant 0 : index
    %55 = vector.load %arg7[%c0_19, %c0_20] : memref<5x64xf32, #tpu.memory_space<vmem>>, vector<5x64xf32>
    tpu.vector_store %arg7[%c0_19, %c0_20], %54 {strides = array<i32>} : memref<5x64xf32, #tpu.memory_space<vmem>>, vector<5x64xf32>,
    %c0_21 = arith.constant 0 : index
    %c0_22 = arith.constant 0 : index
    %56 = vector.load %arg8[%c0_21, %c0_22] : memref<1x64xf32, #tpu.memory_space<vmem>>, vector<1x64xf32>
    %57 = arith.addf %56, %36 : vector<1x64xf32>
    %c0_23 = arith.constant 0 : index
    %c0_24 = arith.constant 0 : index
    %58 = vector.load %arg8[%c0_23, %c0_24] : memref<1x64xf32, #tpu.memory_space<vmem>>, vector<1x64xf32>
    tpu.vector_store %arg8[%c0_23, %c0_24], %57 {strides = array<i32>} : memref<1x64xf32, #tpu.memory_space<vmem>>, vector<1x64xf32>,
    %c0_i32_25 = arith.constant 0 : i32
    %59 = arith.cmpi eq, %arg1, %c0_i32_25 : i32
    %60 = arith.extui %59 : i1 to i32
    %c0_i32_26 = arith.constant 0 : i32
    %61 = arith.cmpi ne, %60, %c0_i32_26 : i32
    scf.if %61 {
      %c0_27 = arith.constant 0 : index
      %c0_28 = arith.constant 0 : index
      %62 = vector.load %arg6[%c0_27, %c0_28] : memref<5x64xf32, #tpu.memory_space<vmem>>, vector<5x64xf32>
      %cst_29 = arith.constant dense<0.000000e+00> : vector<5xf32>
      %63 = vector.multi_reduction <add>, %62, %cst_29 [1] : vector<5x64xf32> to vector<5xf32>
      %64 = vector.shape_cast %63 : vector<5xf32> to vector<5x1xf32>
      %c0_30 = arith.constant 0 : index
      %c0_31 = arith.constant 0 : index
      %65 = vector.load %arg7[%c0_30, %c0_31] : memref<5x64xf32, #tpu.memory_space<vmem>>, vector<5x64xf32>
      %cst_32 = arith.constant dense<0.000000e+00> : vector<5xf32>
      %66 = vector.multi_reduction <add>, %65, %cst_32 [1] : vector<5x64xf32> to vector<5xf32>
      %67 = vector.shape_cast %66 : vector<5xf32> to vector<5x1xf32>
      %c0_33 = arith.constant 0 : index
      %c0_34 = arith.constant 0 : index
      %68 = vector.load %arg5[%c0_33, %c0_34] : memref<5x64xf32, #tpu.memory_space<vmem>>, vector<5x64xf32>
      %69 = vector.shape_cast %68 : vector<5x64xf32> to vector<1x5x64xf32>
      %cst_35 = arith.constant dense<0.000000e+00> : vector<1xf32>
      %70 = vector.multi_reduction <add>, %69, %cst_35 [1, 2] : vector<1x5x64xf32> to vector<1xf32>
      %71 = vector.shape_cast %70 : vector<1xf32> to vector<1x1x1xf32>
      %72 = vector.extract %71[0, 0, 0] : f32 from vector<1x1x1xf32>
      %73 = vector.broadcast %72 : f32 to vector<1x1xf32>
      %c0_36 = arith.constant 0 : index
      %c0_37 = arith.constant 0 : index
      %74 = vector.load %arg8[%c0_36, %c0_37] : memref<1x64xf32, #tpu.memory_space<vmem>>, vector<1x64xf32>
      %75 = vector.shape_cast %74 : vector<1x64xf32> to vector<1x1x64xf32>
      %cst_38 = arith.constant dense<0.000000e+00> : vector<1xf32>
      %76 = vector.multi_reduction <add>, %75, %cst_38 [1, 2] : vector<1x1x64xf32> to vector<1xf32>
      %77 = vector.shape_cast %76 : vector<1xf32> to vector<1x1x1xf32>
      %78 = vector.extract %77[0, 0, 0] : f32 from vector<1x1x1xf32>
      %79 = vector.broadcast %78 : f32 to vector<1x1xf32>
      %80 = vector.shape_cast %64 : vector<5x1xf32> to vector<5x1xf32>
      %81 = vector.broadcast %80 : vector<5x1xf32> to vector<5x128xf32>
      %c0_39 = arith.constant 0 : index
      %c0_40 = arith.constant 0 : index
      %c0_41 = arith.constant 0 : index
      %82 = vector.load %arg4[%c0_39, %c0_40, %c0_41] : memref<1x16x128xf32, #tpu.memory_space<vmem>>, vector<1x5x128xf32>
      %83 = vector.shape_cast %82 : vector<1x5x128xf32> to vector<5x128xf32>
      %84 = vector.shape_cast %81 : vector<5x128xf32> to vector<1x5x128xf32>
      tpu.vector_store %arg4[%c0_39, %c0_40, %c0_41], %84 {strides = array<i32>} : memref<1x16x128xf32, #tpu.memory_space<vmem>>, vector<1x5x128xf32>,
      %85 = vector.shape_cast %73 : vector<1x1xf32> to vector<1x1xf32>
      %86 = vector.broadcast %85 : vector<1x1xf32> to vector<1x128xf32>
      %c0_42 = arith.constant 0 : index
      %c5 = arith.constant 5 : index
      %c0_43 = arith.constant 0 : index
      %87 = vector.load %arg4[%c0_42, %c5, %c0_43] : memref<1x16x128xf32, #tpu.memory_space<vmem>>, vector<1x1x128xf32>
      %88 = vector.shape_cast %87 : vector<1x1x128xf32> to vector<1x128xf32>
      %89 = vector.shape_cast %86 : vector<1x128xf32> to vector<1x1x128xf32>
      tpu.vector_store %arg4[%c0_42, %c5, %c0_43], %89 {strides = array<i32>} : memref<1x16x128xf32, #tpu.memory_space<vmem>>, vector<1x1x128xf32>,
      %90 = vector.shape_cast %79 : vector<1x1xf32> to vector<1x1xf32>
      %91 = vector.broadcast %90 : vector<1x1xf32> to vector<1x128xf32>
      %c0_44 = arith.constant 0 : index
      %c6 = arith.constant 6 : index
      %c0_45 = arith.constant 0 : index
      %92 = vector.load %arg4[%c0_44, %c6, %c0_45] : memref<1x16x128xf32, #tpu.memory_space<vmem>>, vector<1x1x128xf32>
      %93 = vector.shape_cast %92 : vector<1x1x128xf32> to vector<1x128xf32>
      %94 = vector.shape_cast %91 : vector<1x128xf32> to vector<1x1x128xf32>
      tpu.vector_store %arg4[%c0_44, %c6, %c0_45], %94 {strides = array<i32>} : memref<1x16x128xf32, #tpu.memory_space<vmem>>, vector<1x1x128xf32>,
      %95 = vector.shape_cast %67 : vector<5x1xf32> to vector<5x1xf32>
      %96 = vector.broadcast %95 : vector<5x1xf32> to vector<5x128xf32>
      %c0_46 = arith.constant 0 : index
      %c8 = arith.constant 8 : index
      %c0_47 = arith.constant 0 : index
      %97 = vector.load %arg4[%c0_46, %c8, %c0_47] : memref<1x16x128xf32, #tpu.memory_space<vmem>>, vector<1x5x128xf32>
      %98 = vector.shape_cast %97 : vector<1x5x128xf32> to vector<5x128xf32>
      %99 = vector.shape_cast %96 : vector<5x128xf32> to vector<1x5x128xf32>
      tpu.vector_store %arg4[%c0_46, %c8, %c0_47], %99 {strides = array<i32>} : memref<1x16x128xf32, #tpu.memory_space<vmem>>, vector<1x5x128xf32>,
    } else {
    }
    return
  }
  func.func @transform_0(%arg0: i32, %arg1: i32) -> (i32, i32) {
    %c1_i32 = arith.constant 1 : i32
    %0 = arith.muli %arg0, %c1_i32 : i32
    %1 = arith.addi %0, %arg1 : i32
    %c0_i32 = arith.constant 0 : i32
    %2 = arith.minsi %1, %c0_i32 : i32
    %c0_i32_0 = arith.constant 0 : i32
    %c0_i32_1 = arith.constant 0 : i32
    return %c0_i32_0, %2 : i32, i32
  }
  func.func @transform_1(%arg0: i32, %arg1: i32) -> (i32, i32) {
    %c1_i32 = arith.constant 1 : i32
    %0 = arith.muli %arg0, %c1_i32 : i32
    %1 = arith.addi %0, %arg1 : i32
    %c0_i32 = arith.constant 0 : i32
    %2 = arith.minsi %1, %c0_i32 : i32
    %c0_i32_0 = arith.constant 0 : i32
    %c0_i32_1 = arith.constant 0 : i32
    return %c0_i32_0, %2 : i32, i32
  }
  func.func @transform_2(%arg0: i32, %arg1: i32) -> (i32, i32, i32) {
    %c0_i32 = arith.constant 0 : i32
    %c0_i32_0 = arith.constant 0 : i32
    %c0_i32_1 = arith.constant 0 : i32
    return %arg0, %c0_i32, %c0_i32_0 : i32, i32, i32
  }
}

</mosaic_0001>

<bundles_post_ra>
// kernel: tpu_custom_call.1
= control target key start
LH: loop header
LB: loop body
LE: loop exit
PB: predicated region body
PF: predicated region fallthrough
CT: control target
= control target key end

     0   :  { %7 = vsyncpa [#allocation7], 0  ;;  %s346_s0 = inlined_call_operand.hbm [shape: f32[5,64], index: 0, kind: input, shape index: {}]   ;;  %s347_s1 = inlined_call_operand.hbm [shape: s32[1,64], index: 1, kind: input, shape index: {}]   ;;  %s348_s2 = inlined_call_operand.hbm [shape: f32[1,16,128], index: 2, kind: output, shape index: {}]  }
   0x1   :  { %8 = vsyncpa [#allocation10], 0 }
   0x2   :  { %9 = vsyncpa [#allocation8], 0  ;;  %s20_s11 = sshll.u32 %s346_s0, 4  ;;  %s299_s12 = smov [#allocation6]   ;;  %s21_s11 = int_to_ptr.hbm [resolvable:$true] %s20_s11 }
   0x3   :  { %s22_s13 = sshll.u32 %s299_s12, 4  ;;  %s35_s16 = sshll.u32 %s347_s1, 4  ;;  %s23_s13 = int_to_ptr.vmem [resolvable:$true] %s22_s13  ;;  %s36_s16 = int_to_ptr.hbm [resolvable:$true] %s35_s16 }
   0x4   :  { %25 = dma.hbm_to_vmem [thread:$0]  %s21_s11, 128, %s23_s13, [#allocation7]  }
   0x5   :  { %s300_s17 = smov [#allocation9]  }
   0x6   :  { %s37_s18 = sshll.u32 %s300_s17, 4  ;;  %s38_s18 = int_to_ptr.vmem [resolvable:$true] %s37_s18 }
   0x7   :  { %40 = dma.hbm_to_vmem [thread:$0]  %s36_s16, 16, %s38_s18, [#allocation10]  }
   0x8   :  { %293 = dma.done.wait [#allocation7], 128  }
   0x9   :  { %294 = vsyncadd [#allocation7], 4294967168 }
   0xa   :  { %295 = dma.done.wait [#allocation10], 16  }
   0xb   :  { %296 = vsyncadd [#allocation10], 4294967280  ;;  %vm59_vm0 = vcmask 520192   ;;  %v69_v0 = vlaneseq  ;;  %v301_v1 = vmov 0.0   ;;  %v65_v3 = vld [vmem:[#allocation6] sm:$0x1f] }
   0xc   :  { %60 = vst.msk [vmem:[#allocation2] sm:$0x1f] %vm59_vm0, %v301_v1  ;;  %v66_v13 = vld [vmem:[#allocation9] sm:$0x1]  ;;  %vm63_vm6 = vcmask 516096   ;;  %s302_s1 = smov [#allocation11]  }
   0xd   :  { %v70_v2 = vand.u32 127, %v69_v0  ;;  %61 = vst.msk [vmem:[#allocation3] sm:$0x1f] %vm59_vm0, %v301_v1  ;;  %vm112_vm2 = vcmp.ge.s32.totalorder %v66_v13, 0  ;;  %vm113_vm3 = vcmp.lt.s32.totalorder %v66_v13, 5  ;;  %v120_v21 = vshrl.u32 %v69_v0, 7 }
   0xe   :  { %62 = vst.msk [vmem:[#allocation4] sm:$0x1f] %vm59_vm0, %v301_v1  ;;  %vm114_vm4 = vmand %vm112_vm2, %vm113_vm3  ;;  %s186_s19 = sshll.u32 %s302_s1, 4  ;;  %s188_s22 = sshll.u32 %s348_s2, 4  ;;  %s187_s19 = int_to_ptr.vmem [resolvable:$true] %s186_s19  ;;  %s189_s22 = int_to_ptr.hbm [resolvable:$true] %s188_s22 }
   0xf   :  { %vm73_vm1 = vcmp.lt.s32.totalorder %v70_v2, 64  ;;  %64 = vst.msk [vmem:[#allocation5] sm:$0x1] %vm63_vm6, %v301_v1  ;;  %s303_s24 = smov 128   ;;  %s304_s25 = smov 8  }
  0x10   :  { %v77_v4 = vsel %vm73_vm1, %v65_v3, 0.0  ;;  %vm115_vm5 = vmand %vm114_vm4, %vm73_vm1  ;;  %v205_v44 = vsel %vm73_vm1, 1.0, %v301_v1 }
  0x11   :  { %v79_v5 = vsel %vm59_vm0, %v77_v4, -inf  ;;  %v118_v18 = vsel %vm115_vm5, %v66_v13, 0  ;;  %v206_v27 = vsel %vm115_vm5, 1.0, %v301_v1 }
  0x12   :  { %v80_v6 = vrot.slane %v79_v5, 4  ;;  %v121_v22 = vperm.slane %v118_v18, 0  ;;  %v126_v32 = vperm.slane %v206_v27, 0 }
  0x13   :  { %v129_v50 = vld [vmem:[#allocation2] sm:$0x1f] }
  0x14   :  { %v81_v7 = vmax.f32 %v79_v5, %v80_v6  ;;  %v122_v25 = vsub.s32 %v120_v21, %v121_v22  ;;  %v133_v39 = vld [vmem:[#allocation3] sm:$0x1f] }
  0x15   :  { %v136_v48 = vld [vmem:[#allocation4] sm:$0x1f] }
  0x16   :  { %v82_v8 = vrot.slane %v81_v7, 2  ;;  %v139_v28 = vld [vmem:[#allocation5] sm:$0x1]  ;;  %v123_v30 = vcvt.s32.f32 %v122_v25 }
  0x17   :  { %v140_v29 = vadd.f32 %v206_v27, %v139_v28 }
  0x18   :  { %v83_v9 = vmax.f32 %v81_v7, %v82_v8  ;;  %v124_v31 = vmul.f32 %v123_v30, %v123_v30 }
  0x19   :  { %142 = vst.msk [vmem:[#allocation5] sm:$0x1] %vm63_vm6, %v140_v29 }
  0x1a   :  { %v84_v10 = vrot.slane %v83_v9, 1  ;;  %v128_v36 = vmul.f32 %v126_v32, %v124_v31 }
  0x1c   :  { %v85_v11 = vmax.f32 %v83_v9, %v84_v10  ;;  %v134_v41 = vadd.f32 %v133_v39, %v128_v36 }
  0x1e   :  { %v86_v12 = vsub.f32 %v77_v4, %v85_v11  ;;  %135 = vst.msk [vmem:[#allocation3] sm:$0x1f] %vm59_vm0, %v134_v41 }
  0x20   :  { %v87_v14 = vmul.f32 1.442695, %v86_v12  ;;  %v165_v60 = vld [vmem:[#allocation5] sm:$0x1] }
  0x21   :  { %v166_v61 = vsel %vm63_vm6, %v165_v60, 0.0 }
  0x22   :  { %217 = vpow2.f32 %v87_v14 }
  0x25   :  { %v146_v51 = vld [vmem:[#allocation3] sm:$0x1f] }
  0x26   :  { %v147_v53 = vsel %vm59_vm0, %v146_v51, 0.0 }
  0x27   :  { %148 = vadd.xlane.f32.xlu1 %v147_v53 }
  0x28   :  { %v218_v15 = vpop.eup %217 }
  0x29   :  { %v89_v16 = vsel %vm59_vm0, %v218_v15, 0.0 }
  0x2a   :  { %v90_v17 = vrot.slane %v89_v16, 4 }
  0x2c   :  { %v91_v19 = vadd.f32 %v90_v17, %v89_v16 }
  0x2e   :  { %v92_v20 = vrot.slane %v91_v19, 2 }
  0x30   :  { %v93_v23 = vadd.f32 %v92_v20, %v91_v19 }
  0x32   :  { %v94_v24 = vrot.slane %v93_v23, 1 }
  0x34   :  { %v95_v26 = vadd.f32 %v94_v24, %v93_v23 }
  0x36   :  { %219 = vrcp.f32 %v95_v26  ;;  %v107_v35 = vand.u32 2147483648, %v95_v26  ;;  %vm101_vm7 = vweird.f32 %v95_v26  ;;  %v105_v38 = vand.u32 2147483647, %v95_v26 }
  0x38   :  { %v108_v42 = vor.u32 1.1754944e-38, %v107_v35  ;;  %vm106_vm10 = vcmp.eq.f32.partialorder %v105_v38, 8.507059e+37 }
  0x3c   :  { %v220_v33 = vpop.eup %219 }
  0x3d   :  { %v97_v34 = vmul.f32 %v220_v33, %v95_v26  ;;  %vm102_vm8 = vweird.f32 %v220_v33 }
  0x3e   :  { %vm103_vm9 = vmor %vm101_vm7, %vm102_vm8 }
  0x3f   :  { %v98_v37 = vsub.f32 1.0, %v97_v34 }
  0x41   :  { %v99_v40 = vmul.f32 %v220_v33, %v98_v37 }
  0x43   :  { %v100_v43 = vadd.f32 %v220_v33, %v99_v40 }
  0x45   :  { %v104_v45 = vsel %vm103_vm9, %v220_v33, %v100_v43 }
  0x46   :  { %v109_v46 = vsel %vm106_vm10, %v108_v42, %v104_v45 }
  0x47   :  { %v110_v47 = vmul.f32 %v205_v44, %v109_v46 }
  0x49   :  { %v111_v49 = vmul.f32 %v218_v15, %v110_v47 }
  0x4b   :  { %v130_v52 = vmul.f32 %v128_v36, %v111_v49  ;;  %v137_v54 = vadd.f32 %v136_v48, %v111_v49 }
  0x4d   :  { %v131_v55 = vadd.f32 %v130_v52, %v129_v50  ;;  %138 = vst.msk [vmem:[#allocation4] sm:$0x1f] %vm59_vm0, %v137_v54 }
  0x4f   :  { %132 = vst.msk [vmem:[#allocation2] sm:$0x1f] %vm59_vm0, %v131_v55 }
  0x54   :  { %v150_v56 = vld [vmem:[#allocation4] sm:$0x1f] }
  0x55   :  { %v151_v57 = vsel %vm59_vm0, %v150_v56, 0.0 }
  0x56   :  { %v154_v58 = vld [vmem:[#allocation2] sm:$0x1f]  ;;  %152 = vadd.xlane.f32.xlu1 %v151_v57 }
  0x57   :  { %v155_v59 = vsel %vm59_vm0, %v154_v58, 0.0 }
  0x58   :  { %156 = vadd.xlane.f32.xlu0 %v155_v59 }
  0x60   :  { %167 = vadd.xlane.f32.xlu0 %v166_v61 }
  0x9a   :  { %v149_v12 = vpop.xlane.xlu1 %148 }
  0x9b   :  { %176 = vst [vmem:[#allocation11] sm:$0x1f] %v149_v12 }
  0xc9   :  { %v153_v13 = vpop.xlane.xlu1 %152 }
  0xca   :  { %181 = vst [vmem:[#allocation11 + $0x8] sm:$0x1f] %v153_v13 }
  0xcb   :  { %v157_v62 = vpop.xlane.xlu0 %156 }
  0xcc   :  { %v158_v63 = vrot.slane %v157_v62, 4 }
  0xce   :  { %v159_v0 = vadd.f32 %v158_v63, %v157_v62 }
  0xd0   :  { %v160_v1 = vrot.slane %v159_v0, 2 }
  0xd2   :  { %v161_v2 = vadd.f32 %v160_v1, %v159_v0 }
  0xd3   :  { %v168_v3 = vpop.xlane.xlu0 %167 }
  0xd4   :  { %v169_v4 = vrot.slane %v168_v3, 4  ;;  %v162_v5 = vrot.slane %v161_v2, 1 }
  0xd6   :  { %v170_v6 = vadd.f32 %v169_v4, %v168_v3  ;;  %v163_v7 = vadd.f32 %v162_v5, %v161_v2 }
  0xd8   :  { %v171_v8 = vrot.slane %v170_v6, 2  ;;  %207 = vpush %v163_v7 }
  0xda   :  { %v172_v9 = vadd.f32 %v171_v8, %v170_v6 }
  0xdc   :  { %v173_v10 = vrot.slane %v172_v9, 1 }
  0xde   :  { %v174_v11 = vadd.f32 %v173_v10, %v172_v9 }
  0xe0   :  { %209 = vpush %v174_v11 }
 0x109   :  { %s208_s0 = spop %207 }
 0x10a   :  { %v177_v14 = vstv %s208_s0 }
 0x10b   :  { %178 = vst [vmem:[#allocation11 + $0x5] sm:$0x1] %v177_v14 }
 0x111   :  { %s210_s23 = spop %209 }
 0x112   :  { %v179_v15 = vstv %s210_s23 }
 0x113   :  { %180 = vst [vmem:[#allocation11 + $0x6] sm:$0x1] %v179_v15 }
 0x114   :  { %194 = dma.vmem_to_hbm [thread:$0]  %s187_s19, 256, %s189_s22, [#allocation8], %s303_s24, %s303_s24, %s304_s25  }
 0x115   :  { %297 = dma.done.wait [#allocation8], 256  }
 0x116   :  { %298 = vsyncadd [#allocation8], 4294967040 }
 0x117   :  { %199 = vsyncpa [#allocation7], 1 }
 0x118   :  { %200 = vsyncpa [#allocation10], 1 }
 0x119   :  { %201 = vsyncpa [#allocation8], 1 }

</bundles_post_ra>
